<compile_context>
chip_gen: v7x
topology: tpu7x:2x2x1
jax: 0.10.0
libtpu: 0.0.40
codegen_flags: <defaults>
</compile_context>

<pallas_src>
import functools
import math

import jax
import jax.numpy as jnp
from jax import lax
from jax.experimental import pallas as pl
from jax.experimental.pallas import tpu as pltpu


def _pick_tile(n, preferred):
    """Largest multiple-of-8 divisor of n that is <= preferred (else n itself)."""
    if n <= preferred:
        return n
    start = preferred - (preferred % 8)
    for t in range(start, 0, -8):
        if n % t == 0:
            return t
    return n  # awkward n: fall back to full extent; VMEM budget check below still applies


def _shrink_to_divisor(n, cur):
    """Next smaller multiple-of-8 divisor of n below `cur` (or `cur` if none exists)."""
    for t in range(cur - 8, 7, -8):
        if n % t == 0:
            return t
    return cur


# ---------------------------------------------------------------------------
# Pass 1: fused Q/K/V projection (Q pre-scaled by 1/sqrt(d_k))
# ---------------------------------------------------------------------------
def _qkv_proj_kernel(x_ref, wq_ref, bq_ref, wk_ref, bk_ref, wv_ref, bv_ref,
                     q_ref, k_ref, v_ref, *, scale):
    x = x_ref[0]  # (ts, d_model), bf16 operands -> f32 accumulation on the MXU
    q = jnp.dot(x, wq_ref[...], preferred_element_type=jnp.float32) + bq_ref[...]
    k = jnp.dot(x, wk_ref[...], preferred_element_type=jnp.float32) + bk_ref[...]
    v = jnp.dot(x, wv_ref[...], preferred_element_type=jnp.float32) + bv_ref[...]
    q_ref[0] = (q * scale).astype(q_ref.dtype)  # fold 1/sqrt(d_k) into Q once
    k_ref[0] = k.astype(k_ref.dtype)
    v_ref[0] = v.astype(v_ref.dtype)
    # TODO(synk): for very large d_model, add a d_model-reduction grid axis with an f32
    # accumulator (and single-buffer the constant weight blocks) instead of full-weight
    # residency in VMEM.


# ---------------------------------------------------------------------------
# Pass 2: flash-style attention with online softmax over the kv grid axis
# ---------------------------------------------------------------------------
def _flash_attn_kernel(q_ref, k_ref, v_ref, o_ref, m_sc, l_sc, acc_sc):
    ki = pl.program_id(2)

    @pl.when(ki == 0)
    def _():
        m_sc[...] = jnp.full(m_sc.shape, -jnp.inf, dtype=m_sc.dtype)
        l_sc[...] = jnp.zeros(l_sc.shape, dtype=l_sc.dtype)
        acc_sc[...] = jnp.zeros(acc_sc.shape, dtype=acc_sc.dtype)

    q = q_ref[0]   # (tq,  d_k) bf16 -- already scaled by 1/sqrt(d_k)
    k = k_ref[0]   # (tkv, d_k) bf16
    v = v_ref[0]   # (tkv, d_v) bf16

    # Q @ K^T without forming a transposed K tile (contract last dims on the MXU).
    s = lax.dot_general(q, k, (((1,), (1,)), ((), ())),
                        preferred_element_type=jnp.float32)   # (tq, tkv) f32

    m_prev = m_sc[...]
    m_new = jnp.maximum(m_prev, jnp.max(s, axis=-1, keepdims=True))
    alpha = jnp.exp(m_prev - m_new)
    # TODO(synk): on v6e/v7x this exp could run in bf16 for 2x EUP throughput; kept f32
    # for portability (v5e EUP has no bf16) and tighter softmax-sum accuracy.
    p = jnp.exp(s - m_new)
    l_sc[...] = alpha * l_sc[...] + jnp.sum(p, axis=-1, keepdims=True)
    acc_sc[...] = alpha * acc_sc[...] + jnp.dot(
        p.astype(v.dtype), v, preferred_element_type=jnp.float32)
    m_sc[...] = m_new

    @pl.when(ki == pl.num_programs(2) - 1)
    def _():
        # Exact divide: runs once per (b, qi) tile, so an approx reciprocal saves nothing
        # and costs accuracy.
        o_ref[0] = (acc_sc[...] / l_sc[...]).astype(o_ref.dtype)


def self_attention(x, wq, bq, wk, bk, wv, bv, *, tq=512, tkv=1024, tproj=512,
                   compute_dtype=jnp.bfloat16):
    """x: (B, S, d_model); w*: (d_model, d_out); b*: (1, d_out).  Output: (B, S, d_v) f32."""
    B, S, d_model = x.shape
    d_k = wq.shape[1]
    d_v = wv.shape[1]
    scale = 1.0 / math.sqrt(d_k)
    out_dtype = x.dtype

    # No feature-axis padding: a block whose last dim equals the full array dim is legal,
    # and padding small head dims (e.g. 16 -> 128) amplifies the Q/K/V HBM round trip 8x.
    # TODO(synk): for a multi-head variant, fuse heads so the feature axis is naturally
    # lane-dense (>=128) rather than padding each small head.

    # bf16 operands for the MXUs; biases stay f32 and are added to the f32 accumulators.
    x_c = x.astype(compute_dtype)
    wq_c = wq.astype(compute_dtype)
    wk_c = wk.astype(compute_dtype)
    wv_c = wv.astype(compute_dtype)
    bq_f = bq.astype(jnp.float32)
    bk_f = bk.astype(jnp.float32)
    bv_f = bv.astype(jnp.float32)

    vmem_limit = 48 * 1024 * 1024  # above every chip's scoped default, below v7x physical

    # ---- pass 1: projections (done once; NOT redone per kv tile) ----
    ts = _pick_tile(S, tproj)

    def _const_spec(shape):
        return pl.BlockSpec(shape, lambda b, i, _n=len(shape): (0,) * _n)

    q, k, v = pl.pallas_call(
        functools.partial(_qkv_proj_kernel, scale=scale),
        out_shape=(jax.ShapeDtypeStruct((B, S, d_k), compute_dtype),
                   jax.ShapeDtypeStruct((B, S, d_k), compute_dtype),
                   jax.ShapeDtypeStruct((B, S, d_v), compute_dtype)),
        grid_spec=pltpu.PrefetchScalarGridSpec(
            num_scalar_prefetch=0,
            grid=(B, S // ts),
            in_specs=[
                pl.BlockSpec((1, ts, d_model), lambda b, i: (b, i, 0)),   # x tile
                _const_spec((d_model, d_k)), _const_spec((1, d_k)),       # Wq, bq
                _const_spec((d_model, d_k)), _const_spec((1, d_k)),       # Wk, bk
                _const_spec((d_model, d_v)), _const_spec((1, d_v)),       # Wv, bv
            ],
            out_specs=(
                pl.BlockSpec((1, ts, d_k), lambda b, i: (b, i, 0)),
                pl.BlockSpec((1, ts, d_k), lambda b, i: (b, i, 0)),
                pl.BlockSpec((1, ts, d_v), lambda b, i: (b, i, 0)),
            )),
        compiler_params=pltpu.CompilerParams(
            dimension_semantics=("parallel", "parallel"),
            vmem_limit_bytes=vmem_limit),
    )(x_c, wq_c, bq_f, wk_c, bk_f, wv_c, bv_f)

    # ---- pass 2: flash attention ----
    # Grow tq first (K/V HBM re-reads scale as S/tq), tkv amortizes per-step overhead.
    tq_ = _pick_tile(S, tq)
    tkv_ = _pick_tile(S, tkv)

    # Budget check sized for the smallest-VMEM chip (v7x: 64 MiB physical, 32 MiB scoped
    # default): double-buffered Q/K/V/O tiles + f32 m/l/acc scratch, capped well under the
    # raised vmem_limit.  Shrink tkv before tq (tq cuts K/V HBM traffic; tkv only costs
    # ~0.35us per extra grid step).
    itemsize = jnp.dtype(compute_dtype).itemsize

    def _footprint(tq_t, tkv_t):
        tiles = 2 * (tq_t * d_k + tkv_t * (d_k + d_v) + tq_t * d_v) * itemsize
        scratch = 4 * (2 * tq_t + tq_t * d_v)
        return tiles + scratch

    budget = 28 * 1024 * 1024
    while _footprint(tq_, tkv_) > budget and tkv_ > 8:
        nxt = _shrink_to_divisor(S, tkv_)
        if nxt == tkv_:
            break
        tkv_ = nxt
    while _footprint(tq_, tkv_) > budget and tq_ > 8:
        nxt = _shrink_to_divisor(S, tq_)
        if nxt == tq_:
            break
        tq_ = nxt
    # Note: B * (S // tq_) should be >= 2 so both v7x TensorCores get parallel work; at
    # B >= 2 (as here) this always holds.

    out = pl.pallas_call(
        _flash_attn_kernel,
        out_shape=jax.ShapeDtypeStruct((B, S, d_v), out_dtype),
        grid_spec=pltpu.PrefetchScalarGridSpec(
            num_scalar_prefetch=0,
            grid=(B, S // tq_, S // tkv_),
            in_specs=[
                pl.BlockSpec((1, tq_, d_k), lambda b, qi, ki: (b, qi, 0)),
                pl.BlockSpec((1, tkv_, d_k), lambda b, qi, ki: (b, ki, 0)),
                pl.BlockSpec((1, tkv_, d_v), lambda b, qi, ki: (b, ki, 0)),
            ],
            out_specs=pl.BlockSpec((1, tq_, d_v), lambda b, qi, ki: (b, qi, 0)),
            scratch_shapes=[
                pltpu.VMEM((tq_, 1), jnp.float32),      # running max m
                pltpu.VMEM((tq_, 1), jnp.float32),      # running sum l
                pltpu.VMEM((tq_, d_v), jnp.float32),    # output accumulator
            ]),
        compiler_params=pltpu.CompilerParams(
            dimension_semantics=("parallel", "parallel", "arbitrary"),
            vmem_limit_bytes=vmem_limit),
    )(q, k, v)

    return out


def reference(x, wq, bq, wk, bk, wv, bv):
    q = x @ wq + bq
    k = x @ wk + bk
    v = x @ wv + bv
    scores = jnp.einsum("bqd,bkd->bqk", q, k) / jnp.sqrt(jnp.float32(wq.shape[1]))
    attn = jax.nn.softmax(scores, axis=-1)
    return jnp.einsum("bqk,bkd->bqd", attn, v)


if __name__ == "__main__":
    B, S, d_model, d_k, d_v = 2, 8, 32, 16, 16

    key = jax.random.PRNGKey(0)
    kx, kq, kbq, kk, kbk, kv, kbv = jax.random.split(key, 7)

    x = jax.random.normal(kx, (B, S, d_model), dtype=jnp.float32)

    # Deterministic parameter init (nn.Linear-style uniform bound 1/sqrt(fan_in)),
    # stored transposed as (in_features, out_features).
    bound = 1.0 / math.sqrt(d_model)
    wq = jax.random.uniform(kq, (d_model, d_k), jnp.float32, -bound, bound)
    bq = jax.random.uniform(kbq, (1, d_k), jnp.float32, -bound, bound)
    wk = jax.random.uniform(kk, (d_model, d_k), jnp.float32, -bound, bound)
    bk = jax.random.uniform(kbk, (1, d_k), jnp.float32, -bound, bound)
    wv = jax.random.uniform(kv, (d_model, d_v), jnp.float32, -bound, bound)
    bv = jax.random.uniform(kbv, (1, d_v), jnp.float32, -bound, bound)

    out = self_attention(x, wq, bq, wk, bk, wv, bv)
    out = jax.block_until_ready(out)

    ref = reference(x, wq, bq, wk, bk, wv, bv)
    assert out.shape == (B, S, d_v), out.shape
    # Tolerance reflects the bf16 Q/K/V intermediates (MXU-native); all accumulation,
    # softmax statistics and the final normalization are exact f32.
    err = float(jnp.max(jnp.abs(out - ref)))
    assert jnp.allclose(out, ref, atol=2e-2, rtol=2e-2), err

    print("KERNEL_OK")
</pallas_src>

<mosaic_0001>
module attributes {stable_mosaic.version = 11 : i64} {
  func.func @_qkv_proj_kernel(%arg0: i32, %arg1: i32, %arg2: memref<1x8x32xbf16, #tpu.memory_space<vmem>>, %arg3: memref<32x16xbf16, #tpu.memory_space<vmem>>, %arg4: memref<1x16xf32, #tpu.memory_space<vmem>>, %arg5: memref<32x16xbf16, #tpu.memory_space<vmem>>, %arg6: memref<1x16xf32, #tpu.memory_space<vmem>>, %arg7: memref<32x16xbf16, #tpu.memory_space<vmem>>, %arg8: memref<1x16xf32, #tpu.memory_space<vmem>>, %arg9: memref<1x8x16xbf16, #tpu.memory_space<vmem>>, %arg10: memref<1x8x16xbf16, #tpu.memory_space<vmem>>, %arg11: memref<1x8x16xbf16, #tpu.memory_space<vmem>>) attributes {dimension_semantics = [#tpu.dimension_semantics<parallel>, #tpu.dimension_semantics<parallel>], iteration_bounds = array<i64: 2, 1>, scalar_prefetch = 0 : i64, scratch_operands = 0 : i64, tpu.core_type = #tpu.core_type<tc>, window_params = [{transform_indices = @transform_0, window_bounds = array<i64: 1, 8, 32>}, {pipeline_mode = #tpu.pipeline_mode<synchronous>, transform_indices = @transform_1, window_bounds = array<i64: 32, 16>}, {pipeline_mode = #tpu.pipeline_mode<synchronous>, transform_indices = @transform_2, window_bounds = array<i64: 1, 16>}, {pipeline_mode = #tpu.pipeline_mode<synchronous>, transform_indices = @transform_3, window_bounds = array<i64: 32, 16>}, {pipeline_mode = #tpu.pipeline_mode<synchronous>, transform_indices = @transform_4, window_bounds = array<i64: 1, 16>}, {pipeline_mode = #tpu.pipeline_mode<synchronous>, transform_indices = @transform_5, window_bounds = array<i64: 32, 16>}, {pipeline_mode = #tpu.pipeline_mode<synchronous>, transform_indices = @transform_6, window_bounds = array<i64: 1, 16>}, {transform_indices = @transform_7, window_bounds = array<i64: 1, 8, 16>}, {transform_indices = @transform_8, window_bounds = array<i64: 1, 8, 16>}, {transform_indices = @transform_9, window_bounds = array<i64: 1, 8, 16>}]} {
    %c0 = arith.constant 0 : index
    %c0_0 = arith.constant 0 : index
    %c0_1 = arith.constant 0 : index
    %0 = vector.load %arg2[%c0, %c0_0, %c0_1] : memref<1x8x32xbf16, #tpu.memory_space<vmem>>, vector<1x8x32xbf16>
    %1 = vector.shape_cast %0 : vector<1x8x32xbf16> to vector<8x32xbf16>
    %c0_2 = arith.constant 0 : index
    %c0_3 = arith.constant 0 : index
    %2 = vector.load %arg3[%c0_2, %c0_3] : memref<32x16xbf16, #tpu.memory_space<vmem>>, vector<32x16xbf16>
    %cst = arith.constant dense<0.000000e+00> : vector<8x16xf32>
    %3 = tpu.matmul %1, %2, %cst {dimension_numbers = #tpu.dot_dimension_numbers<[1], [0], [0], [1], [0, 0, 1, 1], [], []>} : vector<8x32xbf16>, vector<32x16xbf16>, vector<8x16xf32> -> vector<8x16xf32>
    %c0_4 = arith.constant 0 : index
    %c0_5 = arith.constant 0 : index
    %4 = vector.load %arg4[%c0_4, %c0_5] : memref<1x16xf32, #tpu.memory_space<vmem>>, vector<1x16xf32>
    %5 = vector.broadcast %4 : vector<1x16xf32> to vector<8x16xf32>
    %6 = arith.addf %3, %5 : vector<8x16xf32>
    %c0_6 = arith.constant 0 : index
    %c0_7 = arith.constant 0 : index
    %7 = vector.load %arg5[%c0_6, %c0_7] : memref<32x16xbf16, #tpu.memory_space<vmem>>, vector<32x16xbf16>
    %cst_8 = arith.constant dense<0.000000e+00> : vector<8x16xf32>
    %8 = tpu.matmul %1, %7, %cst_8 {dimension_numbers = #tpu.dot_dimension_numbers<[1], [0], [0], [1], [0, 0, 1, 1], [], []>} : vector<8x32xbf16>, vector<32x16xbf16>, vector<8x16xf32> -> vector<8x16xf32>
    %c0_9 = arith.constant 0 : index
    %c0_10 = arith.constant 0 : index
    %9 = vector.load %arg6[%c0_9, %c0_10] : memref<1x16xf32, #tpu.memory_space<vmem>>, vector<1x16xf32>
    %10 = vector.broadcast %9 : vector<1x16xf32> to vector<8x16xf32>
    %11 = arith.addf %8, %10 : vector<8x16xf32>
    %c0_11 = arith.constant 0 : index
    %c0_12 = arith.constant 0 : index
    %12 = vector.load %arg7[%c0_11, %c0_12] : memref<32x16xbf16, #tpu.memory_space<vmem>>, vector<32x16xbf16>
    %cst_13 = arith.constant dense<0.000000e+00> : vector<8x16xf32>
    %13 = tpu.matmul %1, %12, %cst_13 {dimension_numbers = #tpu.dot_dimension_numbers<[1], [0], [0], [1], [0, 0, 1, 1], [], []>} : vector<8x32xbf16>, vector<32x16xbf16>, vector<8x16xf32> -> vector<8x16xf32>
    %c0_14 = arith.constant 0 : index
    %c0_15 = arith.constant 0 : index
    %14 = vector.load %arg8[%c0_14, %c0_15] : memref<1x16xf32, #tpu.memory_space<vmem>>, vector<1x16xf32>
    %15 = vector.broadcast %14 : vector<1x16xf32> to vector<8x16xf32>
    %16 = arith.addf %13, %15 : vector<8x16xf32>
    %cst_16 = arith.constant 2.500000e-01 : f32
    %17 = vector.broadcast %cst_16 : f32 to vector<8x16xf32>
    %18 = arith.mulf %6, %17 : vector<8x16xf32>
    %19 = arith.truncf %18 : vector<8x16xf32> to vector<8x16xbf16>
    %c0_17 = arith.constant 0 : index
    %c0_18 = arith.constant 0 : index
    %c0_19 = arith.constant 0 : index
    %20 = vector.load %arg9[%c0_17, %c0_18, %c0_19] : memref<1x8x16xbf16, #tpu.memory_space<vmem>>, vector<1x8x16xbf16>
    %21 = vector.shape_cast %20 : vector<1x8x16xbf16> to vector<8x16xbf16>
    %22 = vector.shape_cast %19 : vector<8x16xbf16> to vector<1x8x16xbf16>
    tpu.vector_store %arg9[%c0_17, %c0_18, %c0_19], %22 {strides = array<i32>} : memref<1x8x16xbf16, #tpu.memory_space<vmem>>, vector<1x8x16xbf16>,
    %23 = arith.truncf %11 : vector<8x16xf32> to vector<8x16xbf16>
    %c0_20 = arith.constant 0 : index
    %c0_21 = arith.constant 0 : index
    %c0_22 = arith.constant 0 : index
    %24 = vector.load %arg10[%c0_20, %c0_21, %c0_22] : memref<1x8x16xbf16, #tpu.memory_space<vmem>>, vector<1x8x16xbf16>
    %25 = vector.shape_cast %24 : vector<1x8x16xbf16> to vector<8x16xbf16>
    %26 = vector.shape_cast %23 : vector<8x16xbf16> to vector<1x8x16xbf16>
    tpu.vector_store %arg10[%c0_20, %c0_21, %c0_22], %26 {strides = array<i32>} : memref<1x8x16xbf16, #tpu.memory_space<vmem>>, vector<1x8x16xbf16>,
    %27 = arith.truncf %16 : vector<8x16xf32> to vector<8x16xbf16>
    %c0_23 = arith.constant 0 : index
    %c0_24 = arith.constant 0 : index
    %c0_25 = arith.constant 0 : index
    %28 = vector.load %arg11[%c0_23, %c0_24, %c0_25] : memref<1x8x16xbf16, #tpu.memory_space<vmem>>, vector<1x8x16xbf16>
    %29 = vector.shape_cast %28 : vector<1x8x16xbf16> to vector<8x16xbf16>
    %30 = vector.shape_cast %27 : vector<8x16xbf16> to vector<1x8x16xbf16>
    tpu.vector_store %arg11[%c0_23, %c0_24, %c0_25], %30 {strides = array<i32>} : memref<1x8x16xbf16, #tpu.memory_space<vmem>>, vector<1x8x16xbf16>,
    return
  }
  func.func @transform_0(%arg0: i32, %arg1: i32) -> (i32, i32, i32) {
    %c0_i32 = arith.constant 0 : i32
    %c0_i32_0 = arith.constant 0 : i32
    return %arg0, %arg1, %c0_i32 : i32, i32, i32
  }
  func.func @transform_1(%arg0: i32, %arg1: i32) -> (i32, i32) {
    %c0_i32 = arith.constant 0 : i32
    %c0_i32_0 = arith.constant 0 : i32
    %c0_i32_1 = arith.constant 0 : i32
    return %c0_i32, %c0_i32_0 : i32, i32
  }
  func.func @transform_2(%arg0: i32, %arg1: i32) -> (i32, i32) {
    %c0_i32 = arith.constant 0 : i32
    %c0_i32_0 = arith.constant 0 : i32
    %c0_i32_1 = arith.constant 0 : i32
    return %c0_i32, %c0_i32_0 : i32, i32
  }
  func.func @transform_3(%arg0: i32, %arg1: i32) -> (i32, i32) {
    %c0_i32 = arith.constant 0 : i32
    %c0_i32_0 = arith.constant 0 : i32
    %c0_i32_1 = arith.constant 0 : i32
    return %c0_i32, %c0_i32_0 : i32, i32
  }
  func.func @transform_4(%arg0: i32, %arg1: i32) -> (i32, i32) {
    %c0_i32 = arith.constant 0 : i32
    %c0_i32_0 = arith.constant 0 : i32
    %c0_i32_1 = arith.constant 0 : i32
    return %c0_i32, %c0_i32_0 : i32, i32
  }
  func.func @transform_5(%arg0: i32, %arg1: i32) -> (i32, i32) {
    %c0_i32 = arith.constant 0 : i32
    %c0_i32_0 = arith.constant 0 : i32
    %c0_i32_1 = arith.constant 0 : i32
    return %c0_i32, %c0_i32_0 : i32, i32
  }
  func.func @transform_6(%arg0: i32, %arg1: i32) -> (i32, i32) {
    %c0_i32 = arith.constant 0 : i32
    %c0_i32_0 = arith.constant 0 : i32
    %c0_i32_1 = arith.constant 0 : i32
    return %c0_i32, %c0_i32_0 : i32, i32
  }
  func.func @transform_7(%arg0: i32, %arg1: i32) -> (i32, i32, i32) {
    %c0_i32 = arith.constant 0 : i32
    %c0_i32_0 = arith.constant 0 : i32
    return %arg0, %arg1, %c0_i32 : i32, i32, i32
  }
  func.func @transform_8(%arg0: i32, %arg1: i32) -> (i32, i32, i32) {
    %c0_i32 = arith.constant 0 : i32
    %c0_i32_0 = arith.constant 0 : i32
    return %arg0, %arg1, %c0_i32 : i32, i32, i32
  }
  func.func @transform_9(%arg0: i32, %arg1: i32) -> (i32, i32, i32) {
    %c0_i32 = arith.constant 0 : i32
    %c0_i32_0 = arith.constant 0 : i32
    return %arg0, %arg1, %c0_i32 : i32, i32, i32
  }
}

</mosaic_0001>

<bundles_post_ra>
// kernel: tpu_custom_call.1
= control target key start
LH: loop header
LB: loop body
LE: loop exit
PB: predicated region body
PF: predicated region fallthrough
CT: control target
= control target key end

     0   :  { %s1326_s0 = inlined_call_operand.vmem [shape: bf16[2,8,32], index: 0, kind: input, shape index: {}]   ;;  %s1327_s1 = inlined_call_operand.vmem [shape: bf16[32,16], index: 1, kind: input, shape index: {}]   ;;  %s1328_s2 = inlined_call_operand.vmem [shape: f32[1,16], index: 2, kind: input, shape index: {}]   ;;  %s1329_s3 = inlined_call_operand.vmem [shape: bf16[32,16], index: 3, kind: input, shape index: {}]   ;;  %s1330_s4 = inlined_call_operand.vmem [shape: f32[1,16], index: 4, kind: input, shape index: {}]   ;;  %s1331_s5 = inlined_call_operand.vmem [shape: bf16[32,16], index: 5, kind: input, shape index: {}]   ;;  %s1332_s6 = inlined_call_operand.vmem [shape: f32[1,16], index: 6, kind: input, shape index: {}]   ;;  %s1333_s7 = inlined_call_operand.hbm [shape: bf16[2,8,16], index: 7, kind: output, shape index: {0}]   ;;  %s1334_s8 = inlined_call_operand.hbm [shape: bf16[2,8,16], index: 8, kind: output, shape index: {1}]   ;;  %s1335_s9 = inlined_call_operand.hbm [shape: bf16[2,8,16], index: 9, kind: output, shape index: {2}]  }
   0x1   :  { %1339 = sst [smem:[#allocation9_spill]] %s1326_s0 }
   0x2   :  { %1340 = sst [smem:[#allocation10_spill]] %s1327_s1 }
   0x3   :  { %1341 = sst [smem:[#allocation11_spill]] %s1328_s2 }
   0x4   :  { %1342 = sst [smem:[#allocation12_spill]] %s1329_s3 }
   0x5   :  { %15 = vsyncpa [#allocation3], 0 }
   0x6   :  { %17 = vsyncpa [#allocation3 + $0x1], 0 }
   0x7   :  { %18 = vsyncpa [#allocation5], 0 }
   0x8   :  { %20 = vsyncpa [#allocation5 + $0x1], 0  ;;  %s1095_s30 = smov 0   ;;  %s1097_s10 = smov 0  }
   0x9   :  { %s1099_s11 = smov 0   ;;  %s1101_s12 = smov 0  }
   0xa   :  { %s1103_s13 = smov 0   ;;  %s1105_s14 = smov 0  }
   0xb LB: > { %s765_s15 = sadd.s32 4294967295, %s1038_s14   ;;  %s1336_s16 = sadd.s32 4294967294, %s1038_s14   ;;  %s1038_s14 = sphi %s1105_s14, %s26_s14   ;;  %s1034_s13 = sphi %s1103_s13, %s1358_s13   ;;  %s1030_s12 = sphi %s1101_s12, %s1357_s12   ;;  %s1026_s11 = sphi %s1099_s11, %s1356_s11   ;;  %s1022_s10 = sphi %s1097_s10, %s1355_s10   ;;  %s1018_s30 = sphi %s1095_s30, %s1354_s30  }
   0xc   : > { %s38_s17 = sadd.s32 1, %s1034_s13  ;;  %s201_s18 = sadd.s32 1, %s1026_s11 }
   0xd   : > { %p40_p0 = scmp.ge.s32.totalorder %s38_s17, 2  ;;  %p211_p1 = scmp.ne.s32.totalorder %s1026_s11, %s1022_s10 }
   0xe   : > { %p212_p2 = scmp.eq.s32.totalorder %s765_s15, 1  ;;  %p217_p3 = scmp.ne.s32.totalorder %s1022_s10, %s1018_s30 }
   0xf   : > { %s1360_s17 = smov (%p40_p0, %s38_s17), 0  ;;  %p218_p5 = scmp.eq.s32.totalorder %s1336_s16, 1 }
  0x10   : > { %p1137_p4 = por %p212_p2, %p211_p1  ;;  %s196_s20 = ssub.s32 %s1034_s13, %s1360_s17 }
  0x11   : > { %p769_p6 = scmp.ge.s32.totalorder %s1038_s14, 1  ;;  %p199_p7 = scmp.eq.s32.totalorder %s196_s20, 0 }
  0x12   : > { %p1146_p8 = por %p218_p5, %p217_p3  ;;  %p320_p9 = scmp.lt.s32.totalorder %s1038_s14, 3 }
  0x13   : > { %s1152_s22 = scalar_select %p199_p7, %s1026_s11, %s201_s18  }
  0x14   : > { %p321_p10 = pnand %p769_p6, %p320_p9 }
  0x15   : > { %s1345_s1 = sld [smem:[#allocation10_spill]] (!%p321_p10)  ;;  %v1040_v1 = vmov (!%p321_p10), 0.0   ;;  %s1346_s3 = sld [smem:[#allocation12_spill]] (!%p321_p10)  ;;  %vm1041_vm0 = vmmov (!%p321_p10), 0   ;;  %vm400_vm1 = vcmask (!%p321_p10), 261120   ;;  %v897_v5 = vld [vmem:[%s1331_s5] sm:$0xff] (!%p321_p10)  }
  0x16   : > { %324 = sbr.rel (%p321_p10) target bundleno = 316 (0x13c), region = 48  ;;  %803 = vmatprep.subr.bf16.mxu0 (!%p321_p10), %v1040_v1  ;;  %811 = vmatprep.subr.bf16.mxu1 (!%p321_p10), %v1040_v1  ;;  %p368_p11 = scmp.lt.s32.totalorder (!%p321_p10), %s1030_s12, 1  ;;  %v899_v7 = vld [vmem:[%s1331_s5 + $0x8] sm:$0xff] (!%p321_p10)   ;;  %v778_v10 = vld [vmem:[%s1330_s4] ss:$0 sm:$0xff] (!%p321_p10)  ;;  %vm572_vm2 = vcmask (!%p321_p10), 125952  }
  0x17   : > { %807 = vmatprep.mubr.msk.bf16.mxu0 (!%p321_p10), %vm1041_vm0, %v1040_v1  ;;  %815 = vmatprep.mubr.msk.bf16.mxu1 (!%p321_p10), %vm1041_vm0, %v1040_v1  ;;  %s1347_s0 = sld [smem:[#allocation9_spill]] (!%p321_p10)  ;;  %s1348_s2 = sld [smem:[#allocation11_spill]] (!%p321_p10)  ;;  %v782_v23 = vld [vmem:[%s1332_s6] ss:$0 sm:$0xff] (!%p321_p10) }
  0x18   : > { %s1196_s18 = sshll.u32 (!%p321_p10), %s1030_s12, 6 }
  0x19   : > { %s1204_s27 = scalar_lea.hbm (!%p321_p10), %s1334_s8, %s1196_s18 }
  0x1b   : > { %v894_v0 = vld [vmem:[%s1345_s1] sm:$0xff] (!%p321_p10)   ;;  %v895_v2 = vld [vmem:[%s1345_s1 + $0x8] sm:$0xff] (!%p321_p10)  }
  0x1c   : > { %804 = vmatpush3.bf16.msra.mxu0 (!%p321_p10), %v894_v0  ;;  %v896_v3 = vld [vmem:[%s1346_s3] sm:$0xff] (!%p321_p10)   ;;  %v898_v4 = vld [vmem:[%s1346_s3 + $0x8] sm:$0xff] (!%p321_p10)  }
  0x1d   : > { %805 = vmatprep.subr.bf16.mxu0 %v1040_v1  ;;  %812 = vmatpush3.bf16.msra.mxu1 %v896_v3  ;;  %s369_s29 = scalar_select %p368_p11, %s1030_s12, 1  ;;  %v774_v8 = vld [vmem:[%s1348_s2] ss:$0 sm:$0xff] }
  0x1e   : > { %813 = vmatprep.subr.bf16.mxu1 %v1040_v1  ;;  %s1215_s2 = scalar_lea.hbm %s1333_s7, %s1196_s18 }
  0x1f   : > { %s773_s23 = sshll.u32 %s369_s29, 2  ;;  %s1337_s29 = sand.u32 1, %s1022_s10  }
  0x20   : > { %806 = vmatpush3.bf16.msra.mxu0 %v895_v2  ;;  %s374_s28 = scalar_lea.vmem %s1347_s0, %s773_s23  ;;  %s1186_s25 = sshll.u32 %s1337_s29, 2 }
  0x21   : > { %819 = vmatprep.subr.bf16.mxu0 %v1040_v1  ;;  %v376_v6 = vld [vmem:[%s374_s28] sm:$0xf]  ;;  %814 = vmatpush3.bf16.msra.mxu1 %v898_v4  ;;  %s1193_s28 = sand.u32 1, %s765_s15   ;;  %s360_s20 = scalar_lea.vmem [#allocation4], %s1186_s25 }
  0x22   : > { %s617_s24 = sshll.u32 %s360_s20, 4  ;;  %s353_s23 = scalar_lea.vmem [#allocation2], %s1186_s25  ;;  %s1206_s24 = int_to_ptr.vmem [resolvable:$true] %s617_s24 }
  0x23   : > { %808 = vmatmul.mubr.msk.bf16.vlgmr.msra.gmra.mrb[0].mxu0 %vm400_vm1, %v376_v6  ;;  %s603_s26 = sshll.u32 %s353_s23, 4  ;;  %s1338_s15 = scalar_lea.vmem [#allocation6], %s1186_s25  ;;  %s1217_s26 = int_to_ptr.vmem [resolvable:$true] %s603_s26 }
  0x24   : > { %820 = vmatpush3.bf16.msra.mxu0 %v897_v5  ;;  %823 = vmatprep.mubr.msk.bf16.mxu0 %vm1041_vm0, %v1040_v1  ;;  %s1224_s12 = sshll.u32 %s1338_s15, 4  ;;  %s900_s29 = scalar_lea.vmem %s1206_s24, 64  ;;  %s632_s12 = int_to_ptr.vmem [resolvable:$true] %s1224_s12 }
  0x25   : > { %821 = vmatprep.subr.bf16.mxu0 %v1040_v1  ;;  %816 = vmatmul.mubr.msk.bf16.vlgmr.msra.gmra.mrb[0].mxu1 %vm400_vm1, %v376_v6  ;;  %p901_p12 = scmp.ne.s32.totalorder %s1206_s24, %s900_s29  ;;  %s1042_s0 = smov [#allocation4]  }
  0x26   : > { %s904_s1 = sshll.u32 %s1042_s0, 4  ;;  %s905_s1 = int_to_ptr.vmem [resolvable:$false] %s904_s1 }
  0x27   : > { %p902_p13 = pnand %p901_p12, %p1137_p4  ;;  %s906_s3 = scalar_lea.vmem %s905_s1, 128 }
  0x28   : > { %822 = vmatpush3.bf16.msra.mxu0 %v899_v7  ;;  %p907_p1 = scmp.lt.s32.totalorder %s1206_s24, %s905_s1  ;;  %p908_p2 = scmp.lt.s32.totalorder %s906_s3, %s900_s29 }
  0x29   : > { %p903_p0 = pneg %p902_p13 }
  0x2a   : > { %p909_p3 = por %p908_p2, %p907_p1 }
  0x2b   : > { %824 = vmatmul.mubr.msk.bf16.vlgmr.msra.gmra.mrb[4].mxu0 %vm400_vm1, %v376_v6 }
  0x2c   : > { %p910_p5 = pnand %p909_p3, %p903_p0 }
  0xf6   : > { %v438_v9 = vpop.f32.mrb[0].mxu0 }
  0xf7   : > { %v439_v11 = vadd.f32 %v774_v8, %v438_v9  ;;  %v809_v12 = vpop.f32.mrb[1].mxu0 }
  0xf8   : > { %v441_v13 = vpop.f32.mrb[2].mxu0  ;;  %v501_v14 = vpop.f32.mrb[0].mxu1 }
  0xf9   : > { %v570_v15 = vmul.f32 0.25, %v439_v11  ;;  %v810_v16 = vpop.f32.mrb[3].mxu0  ;;  %v502_v17 = vadd.f32 %v778_v10, %v501_v14  ;;  %v817_v18 = vpop.f32.mrb[1].mxu1 }
  0xfa   : > { %v504_v19 = vpop.f32.mrb[2].mxu1 }
  0xfb   : > { %v571_v20 = vpack.c.bf16 %v570_v15, %v570_v15  ;;  %v574_v21 = vpack.c.bf16 %v502_v17, %v502_v17  ;;  %v818_v22 = vpop.f32.mrb[3].mxu1 }
  0xfd   : > { %575 = vst.msk [vmem:[%s360_s20] sm:$0xf] %vm572_vm2, %v574_v21  ;;  %573 = vst.msk [vmem:[%s353_s23] sm:$0xf] %vm572_vm2, %v571_v20 }
  0xfe   : > { %v564_v24 = vpop.f32.mrb[4].mxu0 }
  0xff   : > { %913 = shalt.err (!%p910_p5)
}
 0x100   : > { %s914_s20 = scalar_lea.hbm %s1204_s27, 64  ;;  %s918_s0 = scalar_lea.hbm %s1334_s8, 128 }
 0x101   : > { %p915_p6 = scmp.ne.s32.totalorder %s1204_s27, %s914_s20  ;;  %p919_p10 = scmp.lt.u32.totalorder %s1204_s27, %s1334_s8 }
 0x102   : > { %p920_p11 = scmp.lt.u32.totalorder %s918_s0, %s914_s20  ;;  %p922_p13 = scmp.lt.u32.totalorder %s914_s20, %s1204_s27 }
 0x103   : > { %p916_p7 = pnand %p915_p6, %p1137_p4 }
 0x104   : > { %p921_p12 = por %p920_p11, %p919_p10 }
 0x105   : > { %p917_p9 = pneg %p916_p7 }
 0x106   : > { %p923_p0 = por %p922_p13, %p921_p12 }
 0x108   : > { %p924_p1 = pnand %p923_p0, %p917_p9 }
 0x10a   : > { %927 = shalt.err (!%p924_p1)
}
 0x10b   : > { %s1349_s3 = scalar_lea.sflag [#allocation5], %s1193_s28  ;;  %v565_v25 = vadd.f32 %v782_v23, %v564_v24  ;;  %v825_v26 = vpop.f32.mrb[5].mxu0  ;;  %s1350_s15 = sand.u32 1, %s1022_s10  }
 0x10c   : > { %828 = dma.vmem_to_hbm [thread:$0]  (%p1137_p4), %s1206_s24, 64, %s1204_s27, %s1349_s3  }
 0x10d   : > { %s579_s16 = scalar_lea.sflag [#allocation3], %s1350_s15  ;;  %s928_s29 = scalar_lea.vmem %s1217_s26, 64 }
 0x10e   : > { %p929_p2 = scmp.ne.s32.totalorder %s1217_s26, %s928_s29  ;;  %s1043_s20 = smov [#allocation2]  }
 0x10f   : > { %s932_s23 = sshll.u32 %s1043_s20, 4  ;;  %s933_s23 = int_to_ptr.vmem [resolvable:$false] %s932_s23 }
 0x110   : > { %p930_p3 = pnand %p929_p2, %p1137_p4  ;;  %s934_s0 = scalar_lea.vmem %s933_s23, 128 }
 0x111   : > { %p935_p6 = scmp.lt.s32.totalorder %s1217_s26, %s933_s23  ;;  %p936_p7 = scmp.lt.s32.totalorder %s934_s0, %s928_s29 }
 0x112   : > { %p931_p5 = pneg %p930_p3 }
 0x113   : > { %p937_p9 = por %p936_p7, %p935_p6 }
 0x115   : > { %p938_p10 = pnand %p937_p9, %p931_p5 }
 0x117   : > { %941 = shalt.err (!%p938_p10)
}
 0x118   : > { %s942_s24 = scalar_lea.hbm %s1215_s2, 64  ;;  %s946_s3 = scalar_lea.hbm %s1333_s7, 128 }
 0x119   : > { %p943_p11 = scmp.ne.s32.totalorder %s1215_s2, %s942_s24  ;;  %p947_p0 = scmp.lt.u32.totalorder %s1215_s2, %s1333_s7 }
 0x11a   : > { %p948_p1 = scmp.lt.u32.totalorder %s946_s3, %s942_s24  ;;  %p950_p3 = scmp.lt.u32.totalorder %s942_s24, %s1215_s2 }
 0x11b   : > { %p944_p12 = pnand %p943_p11, %p1137_p4 }
 0x11c   : > { %p949_p2 = por %p948_p1, %p947_p0 }
 0x11d   : > { %p945_p13 = pneg %p944_p12 }
 0x11e   : > { %p951_p5 = por %p950_p3, %p949_p2 }
 0x120   : > { %p952_p6 = pnand %p951_p5, %p945_p13 }
 0x122   : > { %955 = shalt.err (!%p952_p6)
}
 0x123   : > { %827 = dma.vmem_to_hbm [thread:$0]  (%p1137_p4), %s1217_s26, 64, %s1215_s2, %s579_s16   ;;  %v567_v27 = vpop.f32.mrb[6].mxu0  ;;  %v576_v28 = vpack.c.bf16 %v565_v25, %v565_v25 }
 0x124   : > { %v826_v29 = vpop.f32.mrb[7].mxu0  ;;  %s1277_s0 = scalar_lea.hbm %s1335_s9, %s1196_s18  ;;  %s1351_s24 = scalar_lea.vmem [#allocation6], %s1186_s25 }
 0x125   : > { %577 = vst.msk [vmem:[%s1351_s24] sm:$0xf] %vm572_vm2, %v576_v28  ;;  %s956_s27 = scalar_lea.vmem %s632_s12, 64  ;;  %s1044_s1 = smov [#allocation6]  }
 0x126   : > { %p957_p7 = scmp.ne.s32.totalorder %s632_s12, %s956_s27  ;;  %s960_s3 = sshll.u32 %s1044_s1, 4  ;;  %s961_s3 = int_to_ptr.vmem [resolvable:$false] %s960_s3 }
 0x127   : > { %s962_s2 = scalar_lea.vmem %s961_s3, 128  ;;  %p963_p11 = scmp.lt.s32.totalorder %s632_s12, %s961_s3 }
 0x128   : > { %p958_p9 = pnand %p957_p7, %p1137_p4  ;;  %p964_p12 = scmp.lt.s32.totalorder %s962_s2, %s956_s27 }
 0x12a   : > { %p959_p10 = pneg %p958_p9  ;;  %p965_p13 = por %p964_p12, %p963_p11 }
 0x12c   : > { %p966_p0 = pnand %p965_p13, %p959_p10 }
 0x12e   : > { %969 = shalt.err (!%p966_p0)
}
 0x12f   : > { %s970_s25 = scalar_lea.hbm %s1277_s0, 64  ;;  %s974_s16 = scalar_lea.hbm %s1335_s9, 128 }
 0x130   : > { %p971_p1 = scmp.ne.s32.totalorder %s1277_s0, %s970_s25  ;;  %p975_p5 = scmp.lt.u32.totalorder %s1277_s0, %s1335_s9 }
 0x131   : > { %p976_p6 = scmp.lt.u32.totalorder %s974_s16, %s970_s25  ;;  %p978_p9 = scmp.lt.u32.totalorder %s970_s25, %s1277_s0 }
 0x132   : > { %p972_p2 = pnand %p971_p1, %p1137_p4 }
 0x133   : > { %p977_p7 = por %p976_p6, %p975_p5 }
 0x134   : > { %p973_p3 = pneg %p972_p2 }
 0x135   : > { %p979_p10 = por %p978_p9, %p977_p7 }
 0x137   : > { %p980_p11 = pnand %p979_p10, %p973_p3 }
 0x139   : > { %983 = shalt.err (!%p980_p11)
}
 0x13a   : > { %s1352_s29 = scalar_lea.sflag [#allocation5], %s1193_s28 }
 0x13b   : > { %829 = dma.vmem_to_hbm [thread:$0]  (%p1137_p4), %s632_s12, 64, %s1277_s0, %s1352_s29  }
 0x13c PF: > { %p843_p12 = scmp.ge.s32.totalorder %s1038_s14, 2  ;;  %s643_s23 = sand.u32 1, %s1018_s30  }
 0x13d   : > { %s644_s24 = scalar_lea.sflag [#allocation3], %s643_s23 }
 0x13e   : > { %p834_p13 = pnand %p843_p12, %p1146_p8 }
 0x140   : > { %1009 = dma.done.wait (!%p834_p13), %s644_s24, 64  }
 0x141   : > { %1011 = vsyncadd (!%p834_p13), %s644_s24, 4294967232  ;;  %s1353_s27 = sadd.s32 4294967294, %s1038_s14  }
 0x142   : > { %s652_s1 = sand.u32 1, %s1353_s27  }
 0x143   : > { %s653_s3 = scalar_lea.sflag [#allocation5], %s652_s1 }
 0x144   : > { %1013 = dma.done.wait (!%p834_p13), %s653_s3, 128  }
 0x145   : > { %1015 = vsyncadd (!%p834_p13), %s653_s3, 4294967168  ;;  %s26_s14 = sadd.s32 1, %s1038_s14   ;;  %s1354_s30 = smov %s1022_s10 }
 0x146   : > { %p23_p4 = scmp.ge.s32.totalorder %s26_s14, 4   ;;  %s1355_s10 = smov %s1026_s11 }
 0x147   : > { %s1356_s11 = smov %s1152_s22  ;;  %s1357_s12 = smov %s1034_s13 }
 0x148   : > { %s1358_s13 = smov %s1360_s17  ;;  %25 = sbr.rel (!%p23_p4) target bundleno = 11 (0xb), region = 115 }
 0x14f   :  { %667 = vsyncpa [#allocation3], 1 }
 0x150   :  { %669 = vsyncpa [#allocation3 + $0x1], 1 }
 0x151   :  { %670 = vsyncpa [#allocation5], 1 }
 0x152   :  { %672 = vsyncpa [#allocation5 + $0x1], 1 }

</bundles_post_ra>
